<compile_context>
chip_gen: v7x
topology: tpu7x:2x2x1
jax: 0.10.0
libtpu: 0.0.40
codegen_flags: <defaults>
</compile_context>

<pallas_src>
import jax
import jax.numpy as jnp
from jax.experimental import pallas as pl

# ---- module hyper-parameters (small, consistent with the nn.Module) ----
DIM = 32          # embedding dim
HEADS = 4
DIM_HEAD = 8
INNER = HEADS * DIM_HEAD          # 32
SCALE = DIM_HEAD ** (-0.5)

BATCH = 2
SEQ = 8


def _attention_kernel(x_ref, wqkv_ref, wout_ref, bout_ref, o_ref):
    """Whole problem in one invocation (everything fits in a few KiB of VMEM).

    x_ref   : (B*N, D)       VMEM  (x pre-flattened in the wrapper)
    wqkv_ref: (D, 3*INNER)   VMEM  (Q columns pre-scaled by DIM_HEAD**-0.5)
    wout_ref: (B*H, d, D)    VMEM  (W_out split per head, tiled per batch)
    bout_ref: (1, D)         VMEM
    o_ref   : (B, N, D)      VMEM
    """
    B, N, D = o_ref.shape
    H, d = HEADS, DIM_HEAD

    x2 = x_ref[...]                                           # (B*N, D) f32

    # single QKV projection: (16, 32) @ (32, 96) -> (16, 96) (one MXU matmul
    # instead of one per grid step).
    qkv = jnp.dot(x2, wqkv_ref[...], preferred_element_type=jnp.float32)

    # Gather the per-(batch, head) q/k/v tiles into one leading batch dim of
    # size B*H so both attention contractions are single batched einsums
    # (no per-head Python matmul loop, no kh.T transpose, no lane concatenate).
    def per_head(col0):
        tiles = [qkv[b * N:(b + 1) * N, col0 + h * d: col0 + (h + 1) * d]
                 for b in range(B) for h in range(H)]
        return jnp.stack(tiles, axis=0)                       # (B*H, N, d)

    q = per_head(0)              # scale already folded into W_q
    k = per_head(INNER)
    v = per_head(2 * INNER)

    # scores + numerically stable softmax, batched over B*H
    s = jnp.einsum('bqd,bkd->bqk', q, k,
                   preferred_element_type=jnp.float32)        # (B*H, N, N)
    s = s - jnp.max(s, axis=-1, keepdims=True)
    p = jnp.exp(s)
    # EUP approx reciprocal instead of a VPU divide on the critical path
    p = p * pl.reciprocal(jnp.sum(p, axis=-1, keepdims=True), approx=True)

    o = jnp.einsum('bqk,bkd->bqd', p, v,
                   preferred_element_type=jnp.float32)        # (B*H, N, d)

    # Output projection with the head recombination folded in:
    #   y[b, n, :] = sum_h o[b*H + h, n, :] @ W_out[h*d:(h+1)*d, :] + bias
    contrib = jnp.einsum('bnd,bdo->bno', o, wout_ref[...],
                         preferred_element_type=jnp.float32)  # (B*H, N, D)
    y = jnp.sum(contrib.reshape(B, H, N, D), axis=1) + bout_ref[...]   # (B, N, D)

    # one contiguous full-block store (output is only 512 floats -- ~half a
    # vreg -- so lane-repacking to a 128-wide slab would cost more relayout
    # than the masked store it removes).
    o_ref[...] = y.astype(o_ref.dtype)


@jax.jit
def attention_forward(x, w_qkv, w_out, b_out):
    B, N, D = x.shape

    # One-time constant transforms on the parameters (outside the kernel):
    #  * fold the softmax scale into the Q columns of W_qkv
    #  * split W_out per head and replicate per batch -> (B*H, d, D)
    w_qkv_scaled = jnp.concatenate(
        [w_qkv[:, :INNER] * SCALE, w_qkv[:, INNER:]], axis=-1)
    w_out_bh = jnp.tile(w_out.reshape(HEADS, DIM_HEAD, D), (B, 1, 1))
    b_out2d = b_out.reshape(1, D)
    x2d = x.reshape(B * N, D)          # collapse batch into rows for the QKV matmul

    return pl.pallas_call(
        _attention_kernel,
        out_shape=jax.ShapeDtypeStruct((B, N, D), x.dtype),
        grid=(1,),                      # single kernel step, whole arrays in VMEM
        in_specs=[
            pl.BlockSpec((B * N, D), lambda i: (0, 0)),
            pl.BlockSpec((D, 3 * INNER), lambda i: (0, 0)),
            pl.BlockSpec((B * HEADS, DIM_HEAD, D), lambda i: (0, 0, 0)),
            pl.BlockSpec((1, D), lambda i: (0, 0)),
        ],
        out_specs=pl.BlockSpec((B, N, D), lambda i: (0, 0, 0)),
    )(x2d, w_qkv_scaled, w_out_bh, b_out2d)


def _reference(x, w_qkv, w_out, b_out):
    """Pure-JAX reference mirroring the PyTorch forward."""
    B, N, D = x.shape
    qkv = x @ w_qkv                                        # (B, N, 3*INNER)
    q, k, v = jnp.split(qkv, 3, axis=-1)

    def split_heads(t):                                    # 'b n (h d) -> b h n d'
        return t.reshape(B, N, HEADS, DIM_HEAD).transpose(0, 2, 1, 3)

    q, k, v = map(split_heads, (q, k, v))
    dots = jnp.einsum("bhnd,bhmd->bhnm", q, k) * SCALE
    attn = jax.nn.softmax(dots, axis=-1)
    out = jnp.einsum("bhnm,bhmd->bhnd", attn, v)
    out = out.transpose(0, 2, 1, 3).reshape(B, N, INNER)   # 'b h n d -> b n (h d)'
    return out @ w_out + b_out


if __name__ == "__main__":
    key = jax.random.PRNGKey(0)
    kx, kq, kw, kb = jax.random.split(key, 4)

    x = jax.random.normal(kx, (BATCH, SEQ, DIM), dtype=jnp.float32)

    # deterministic parameter init (synthetic weights, already transposed)
    w_qkv = jax.random.normal(kq, (DIM, 3 * INNER), dtype=jnp.float32) * (DIM ** -0.5)
    w_out = jax.random.normal(kw, (INNER, DIM), dtype=jnp.float32) * (INNER ** -0.5)
    b_out = jax.random.normal(kb, (DIM,), dtype=jnp.float32) * 0.01

    y = attention_forward(x, w_qkv, w_out, b_out)
    y = jax.block_until_ready(y)

    y_ref = _reference(x, w_qkv, w_out, b_out)
    assert y.shape == (BATCH, SEQ, DIM)
    # slightly looser tolerance: softmax denominator uses the EUP approx reciprocal
    assert jnp.allclose(y, y_ref, atol=5e-3, rtol=5e-3), "mismatch vs JAX reference"

    print("KERNEL_OK")
</pallas_src>

<mosaic_0001>
module attributes {stable_mosaic.version = 11 : i64} {
  func.func @_attention_kernel(%arg0: i32, %arg1: memref<16x32xf32, #tpu.memory_space<vmem>>, %arg2: memref<32x96xf32, #tpu.memory_space<vmem>>, %arg3: memref<8x8x32xf32, #tpu.memory_space<vmem>>, %arg4: memref<1x32xf32, #tpu.memory_space<vmem>>, %arg5: memref<2x8x32xf32, #tpu.memory_space<vmem>>) attributes {dimension_semantics = [#tpu.dimension_semantics<arbitrary>], iteration_bounds = array<i64: 1>, scalar_prefetch = 0 : i64, scratch_operands = 0 : i64, tpu.core_type = #tpu.core_type<tc>, window_params = [{pipeline_mode = #tpu.pipeline_mode<synchronous>, transform_indices = @transform_0, window_bounds = array<i64: 16, 32>}, {pipeline_mode = #tpu.pipeline_mode<synchronous>, transform_indices = @transform_1, window_bounds = array<i64: 32, 96>}, {pipeline_mode = #tpu.pipeline_mode<synchronous>, transform_indices = @transform_2, window_bounds = array<i64: 8, 8, 32>}, {pipeline_mode = #tpu.pipeline_mode<synchronous>, transform_indices = @transform_3, window_bounds = array<i64: 1, 32>}, {pipeline_mode = #tpu.pipeline_mode<synchronous>, transform_indices = @transform_4, window_bounds = array<i64: 2, 8, 32>}]} {
    %c0 = arith.constant 0 : index
    %c0_0 = arith.constant 0 : index
    %0 = vector.load %arg1[%c0, %c0_0] : memref<16x32xf32, #tpu.memory_space<vmem>>, vector<16x32xf32>
    %c0_1 = arith.constant 0 : index
    %c0_2 = arith.constant 0 : index
    %1 = vector.load %arg2[%c0_1, %c0_2] : memref<32x96xf32, #tpu.memory_space<vmem>>, vector<32x96xf32>
    %cst = arith.constant dense<0.000000e+00> : vector<16x96xf32>
    %2 = tpu.matmul %0, %1, %cst {dimension_numbers = #tpu.dot_dimension_numbers<[1], [0], [0], [1], [0, 0, 1, 1], [], []>} : vector<16x32xf32>, vector<32x96xf32>, vector<16x96xf32> -> vector<16x96xf32>
    %3 = vector.extract_strided_slice %2 {offsets = [0, 0], sizes = [8, 8], strides = [1, 1]} : vector<16x96xf32> to vector<8x8xf32>
    %4 = vector.extract_strided_slice %2 {offsets = [0, 8], sizes = [8, 8], strides = [1, 1]} : vector<16x96xf32> to vector<8x8xf32>
    %5 = vector.extract_strided_slice %2 {offsets = [0, 16], sizes = [8, 8], strides = [1, 1]} : vector<16x96xf32> to vector<8x8xf32>
    %6 = vector.extract_strided_slice %2 {offsets = [0, 24], sizes = [8, 8], strides = [1, 1]} : vector<16x96xf32> to vector<8x8xf32>
    %7 = vector.extract_strided_slice %2 {offsets = [8, 0], sizes = [8, 8], strides = [1, 1]} : vector<16x96xf32> to vector<8x8xf32>
    %8 = vector.extract_strided_slice %2 {offsets = [8, 8], sizes = [8, 8], strides = [1, 1]} : vector<16x96xf32> to vector<8x8xf32>
    %9 = vector.extract_strided_slice %2 {offsets = [8, 16], sizes = [8, 8], strides = [1, 1]} : vector<16x96xf32> to vector<8x8xf32>
    %10 = vector.extract_strided_slice %2 {offsets = [8, 24], sizes = [8, 8], strides = [1, 1]} : vector<16x96xf32> to vector<8x8xf32>
    %11 = vector.shape_cast %3 : vector<8x8xf32> to vector<1x8x8xf32>
    %12 = vector.shape_cast %4 : vector<8x8xf32> to vector<1x8x8xf32>
    %13 = vector.shape_cast %5 : vector<8x8xf32> to vector<1x8x8xf32>
    %14 = vector.shape_cast %6 : vector<8x8xf32> to vector<1x8x8xf32>
    %15 = vector.shape_cast %7 : vector<8x8xf32> to vector<1x8x8xf32>
    %16 = vector.shape_cast %8 : vector<8x8xf32> to vector<1x8x8xf32>
    %17 = vector.shape_cast %9 : vector<8x8xf32> to vector<1x8x8xf32>
    %18 = vector.shape_cast %10 : vector<8x8xf32> to vector<1x8x8xf32>
    %19 = tpu.concatenate %11, %12, %13, %14, %15, %16, %17, %18 in 0 : vector<1x8x8xf32>, vector<1x8x8xf32>, vector<1x8x8xf32>, vector<1x8x8xf32>, vector<1x8x8xf32>, vector<1x8x8xf32>, vector<1x8x8xf32>, vector<1x8x8xf32> -> vector<8x8x8xf32>
    %20 = vector.extract_strided_slice %2 {offsets = [0, 32], sizes = [8, 8], strides = [1, 1]} : vector<16x96xf32> to vector<8x8xf32>
    %21 = vector.extract_strided_slice %2 {offsets = [0, 40], sizes = [8, 8], strides = [1, 1]} : vector<16x96xf32> to vector<8x8xf32>
    %22 = vector.extract_strided_slice %2 {offsets = [0, 48], sizes = [8, 8], strides = [1, 1]} : vector<16x96xf32> to vector<8x8xf32>
    %23 = vector.extract_strided_slice %2 {offsets = [0, 56], sizes = [8, 8], strides = [1, 1]} : vector<16x96xf32> to vector<8x8xf32>
    %24 = vector.extract_strided_slice %2 {offsets = [8, 32], sizes = [8, 8], strides = [1, 1]} : vector<16x96xf32> to vector<8x8xf32>
    %25 = vector.extract_strided_slice %2 {offsets = [8, 40], sizes = [8, 8], strides = [1, 1]} : vector<16x96xf32> to vector<8x8xf32>
    %26 = vector.extract_strided_slice %2 {offsets = [8, 48], sizes = [8, 8], strides = [1, 1]} : vector<16x96xf32> to vector<8x8xf32>
    %27 = vector.extract_strided_slice %2 {offsets = [8, 56], sizes = [8, 8], strides = [1, 1]} : vector<16x96xf32> to vector<8x8xf32>
    %28 = vector.shape_cast %20 : vector<8x8xf32> to vector<1x8x8xf32>
    %29 = vector.shape_cast %21 : vector<8x8xf32> to vector<1x8x8xf32>
    %30 = vector.shape_cast %22 : vector<8x8xf32> to vector<1x8x8xf32>
    %31 = vector.shape_cast %23 : vector<8x8xf32> to vector<1x8x8xf32>
    %32 = vector.shape_cast %24 : vector<8x8xf32> to vector<1x8x8xf32>
    %33 = vector.shape_cast %25 : vector<8x8xf32> to vector<1x8x8xf32>
    %34 = vector.shape_cast %26 : vector<8x8xf32> to vector<1x8x8xf32>
    %35 = vector.shape_cast %27 : vector<8x8xf32> to vector<1x8x8xf32>
    %36 = tpu.concatenate %28, %29, %30, %31, %32, %33, %34, %35 in 0 : vector<1x8x8xf32>, vector<1x8x8xf32>, vector<1x8x8xf32>, vector<1x8x8xf32>, vector<1x8x8xf32>, vector<1x8x8xf32>, vector<1x8x8xf32>, vector<1x8x8xf32> -> vector<8x8x8xf32>
    %37 = vector.extract_strided_slice %2 {offsets = [0, 64], sizes = [8, 8], strides = [1, 1]} : vector<16x96xf32> to vector<8x8xf32>
    %38 = vector.extract_strided_slice %2 {offsets = [0, 72], sizes = [8, 8], strides = [1, 1]} : vector<16x96xf32> to vector<8x8xf32>
    %39 = vector.extract_strided_slice %2 {offsets = [0, 80], sizes = [8, 8], strides = [1, 1]} : vector<16x96xf32> to vector<8x8xf32>
    %40 = vector.extract_strided_slice %2 {offsets = [0, 88], sizes = [8, 8], strides = [1, 1]} : vector<16x96xf32> to vector<8x8xf32>
    %41 = vector.extract_strided_slice %2 {offsets = [8, 64], sizes = [8, 8], strides = [1, 1]} : vector<16x96xf32> to vector<8x8xf32>
    %42 = vector.extract_strided_slice %2 {offsets = [8, 72], sizes = [8, 8], strides = [1, 1]} : vector<16x96xf32> to vector<8x8xf32>
    %43 = vector.extract_strided_slice %2 {offsets = [8, 80], sizes = [8, 8], strides = [1, 1]} : vector<16x96xf32> to vector<8x8xf32>
    %44 = vector.extract_strided_slice %2 {offsets = [8, 88], sizes = [8, 8], strides = [1, 1]} : vector<16x96xf32> to vector<8x8xf32>
    %45 = vector.shape_cast %37 : vector<8x8xf32> to vector<1x8x8xf32>
    %46 = vector.shape_cast %38 : vector<8x8xf32> to vector<1x8x8xf32>
    %47 = vector.shape_cast %39 : vector<8x8xf32> to vector<1x8x8xf32>
    %48 = vector.shape_cast %40 : vector<8x8xf32> to vector<1x8x8xf32>
    %49 = vector.shape_cast %41 : vector<8x8xf32> to vector<1x8x8xf32>
    %50 = vector.shape_cast %42 : vector<8x8xf32> to vector<1x8x8xf32>
    %51 = vector.shape_cast %43 : vector<8x8xf32> to vector<1x8x8xf32>
    %52 = vector.shape_cast %44 : vector<8x8xf32> to vector<1x8x8xf32>
    %53 = tpu.concatenate %45, %46, %47, %48, %49, %50, %51, %52 in 0 : vector<1x8x8xf32>, vector<1x8x8xf32>, vector<1x8x8xf32>, vector<1x8x8xf32>, vector<1x8x8xf32>, vector<1x8x8xf32>, vector<1x8x8xf32>, vector<1x8x8xf32> -> vector<8x8x8xf32>
    "tpu.trace_start"() <{level = 10 : i32, message = "bqd,bkd->bqk"}> : () -> ()
    %cst_3 = arith.constant dense<0.000000e+00> : vector<8x8x8xf32>
    %54 = tpu.matmul %19, %36, %cst_3 {dimension_numbers = #tpu.dot_dimension_numbers<[2], [2], [1], [1], [0, 0, 0, 1, 1, 1], [0], [0]>} : vector<8x8x8xf32>, vector<8x8x8xf32>, vector<8x8x8xf32> -> vector<8x8x8xf32>
    "tpu.trace_stop"() : () -> ()
    %cst_4 = arith.constant dense<0xFF800000> : vector<8x8xf32>
    %55 = vector.multi_reduction <maximumf>, %54, %cst_4 [2] : vector<8x8x8xf32> to vector<8x8xf32>
    %56 = vector.shape_cast %55 : vector<8x8xf32> to vector<8x8x1xf32>
    %57 = vector.broadcast %56 : vector<8x8x1xf32> to vector<8x8x8xf32>
    %58 = arith.subf %54, %57 : vector<8x8x8xf32>
    %59 = math.exp %58 : vector<8x8x8xf32>
    %cst_5 = arith.constant dense<0.000000e+00> : vector<8x8xf32>
    %60 = vector.multi_reduction <add>, %59, %cst_5 [2] : vector<8x8x8xf32> to vector<8x8xf32>
    %61 = vector.shape_cast %60 : vector<8x8xf32> to vector<8x8x1xf32>
    %62 = tpu.reciprocal %61 {approx = true} : vector<8x8x1xf32> -> vector<8x8x1xf32>
    %63 = vector.broadcast %62 : vector<8x8x1xf32> to vector<8x8x8xf32>
    %64 = arith.mulf %59, %63 : vector<8x8x8xf32>
    "tpu.trace_start"() <{level = 10 : i32, message = "bqk,bkd->bqd"}> : () -> ()
    %cst_6 = arith.constant dense<0.000000e+00> : vector<8x8x8xf32>
    %65 = tpu.matmul %64, %53, %cst_6 {dimension_numbers = #tpu.dot_dimension_numbers<[2], [1], [1], [2], [0, 0, 0, 1, 1, 2], [0], [0]>} : vector<8x8x8xf32>, vector<8x8x8xf32>, vector<8x8x8xf32> -> vector<8x8x8xf32>
    "tpu.trace_stop"() : () -> ()
    %c0_7 = arith.constant 0 : index
    %c0_8 = arith.constant 0 : index
    %c0_9 = arith.constant 0 : index
    %66 = vector.load %arg3[%c0_7, %c0_8, %c0_9] : memref<8x8x32xf32, #tpu.memory_space<vmem>>, vector<8x8x32xf32>
    "tpu.trace_start"() <{level = 10 : i32, message = "bnd,bdo->bno"}> : () -> ()
    %cst_10 = arith.constant dense<0.000000e+00> : vector<8x8x32xf32>
    %67 = tpu.matmul %65, %66, %cst_10 {dimension_numbers = #tpu.dot_dimension_numbers<[2], [1], [1], [2], [0, 0, 0, 1, 1, 2], [0], [0]>} : vector<8x8x8xf32>, vector<8x8x32xf32>, vector<8x8x32xf32> -> vector<8x8x32xf32>
    "tpu.trace_stop"() : () -> ()
    %68 = vector.shape_cast %67 : vector<8x8x32xf32> to vector<2x4x8x32xf32>
    %cst_11 = arith.constant dense<0.000000e+00> : vector<2x8x32xf32>
    %69 = vector.multi_reduction <add>, %68, %cst_11 [1] : vector<2x4x8x32xf32> to vector<2x8x32xf32>
    %c0_12 = arith.constant 0 : index
    %c0_13 = arith.constant 0 : index
    %70 = vector.load %arg4[%c0_12, %c0_13] : memref<1x32xf32, #tpu.memory_space<vmem>>, vector<1x32xf32>
    %71 = vector.shape_cast %70 : vector<1x32xf32> to vector<1x1x32xf32>
    %72 = vector.broadcast %71 : vector<1x1x32xf32> to vector<2x8x32xf32>
    %73 = arith.addf %69, %72 : vector<2x8x32xf32>
    %c0_14 = arith.constant 0 : index
    %c0_15 = arith.constant 0 : index
    %c0_16 = arith.constant 0 : index
    %74 = vector.load %arg5[%c0_14, %c0_15, %c0_16] : memref<2x8x32xf32, #tpu.memory_space<vmem>>, vector<2x8x32xf32>
    tpu.vector_store %arg5[%c0_14, %c0_15, %c0_16], %73 {strides = array<i32>} : memref<2x8x32xf32, #tpu.memory_space<vmem>>, vector<2x8x32xf32>,
    return
  }
  func.func @transform_0(%arg0: i32) -> (i32, i32) {
    %c0_i32 = arith.constant 0 : i32
    %c0_i32_0 = arith.constant 0 : i32
    %c0_i32_1 = arith.constant 0 : i32
    return %c0_i32, %c0_i32_0 : i32, i32
  }
  func.func @transform_1(%arg0: i32) -> (i32, i32) {
    %c0_i32 = arith.constant 0 : i32
    %c0_i32_0 = arith.constant 0 : i32
    %c0_i32_1 = arith.constant 0 : i32
    return %c0_i32, %c0_i32_0 : i32, i32
  }
  func.func @transform_2(%arg0: i32) -> (i32, i32, i32) {
    %c0_i32 = arith.constant 0 : i32
    %c0_i32_0 = arith.constant 0 : i32
    %c0_i32_1 = arith.constant 0 : i32
    %c0_i32_2 = arith.constant 0 : i32
    return %c0_i32, %c0_i32_0, %c0_i32_1 : i32, i32, i32
  }
  func.func @transform_3(%arg0: i32) -> (i32, i32) {
    %c0_i32 = arith.constant 0 : i32
    %c0_i32_0 = arith.constant 0 : i32
    %c0_i32_1 = arith.constant 0 : i32
    return %c0_i32, %c0_i32_0 : i32, i32
  }
  func.func @transform_4(%arg0: i32) -> (i32, i32, i32) {
    %c0_i32 = arith.constant 0 : i32
    %c0_i32_0 = arith.constant 0 : i32
    %c0_i32_1 = arith.constant 0 : i32
    %c0_i32_2 = arith.constant 0 : i32
    return %c0_i32, %c0_i32_0, %c0_i32_1 : i32, i32, i32
  }
}

</mosaic_0001>

<bundles_post_ra>
// kernel: attention_forward.1
= control target key start
LH: loop header
LB: loop body
LE: loop exit
PB: predicated region body
PF: predicated region fallthrough
CT: control target
= control target key end

     0   :  { %vm24_vm0 = vcmask 261120   ;;  %s2638_s0 = inlined_call_operand.vmem [shape: f32[16,32], index: 0, kind: input, shape index: {}]   ;;  %s2639_s1 = inlined_call_operand.vmem [shape: f32[32,96], index: 1, kind: input, shape index: {}]   ;;  %s2640_s2 = inlined_call_operand.vmem [shape: f32[8,8,32], index: 2, kind: input, shape index: {}]   ;;  %s2641_s3 = inlined_call_operand.vmem [shape: f32[1,32], index: 3, kind: input, shape index: {}]   ;;  %s2642_s4 = inlined_call_operand.hbm [shape: f32[2,8,32], index: 4, kind: output, shape index: {}]  }
   0x1   :  { %v20_v0 = vld [vmem:[%s2639_s1] sm:$0xff]  ;;  %v21_v1 = vld [vmem:[%s2639_s1 + $0x8] sm:$0xff]  ;;  %v22_v2 = vld [vmem:[%s2639_s1 + $0x10] sm:$0xff] }
   0x2   :  { %v2278_v3 = vpack.c.bf16 %v21_v1, %v20_v0  ;;  %v23_v4 = vld [vmem:[%s2639_s1 + $0x18] sm:$0xff]  ;;  %v18_v5 = vld [vmem:[%s2638_s0] sm:$0xff] }
   0x3   :  { %v2282_v6 = vpack.c.bf16 %v23_v4, %v22_v2  ;;  %2155 = vmatprep.mubr.msk.f32.mxu0 %vm24_vm0, %v18_v5 }
   0x4   :  { %9 = vsyncpa [#allocation3], 0  ;;  %2279 = vmatprep.subr.bf16.mxu0 %v2278_v3  ;;  %v19_v7 = vld [vmem:[%s2638_s0 + $0x8] sm:$0xff]  ;;  %v2352_v8 = vmov 0.0   ;;  %s2353_s1 = smov 104   ;;  %s2354_s27 = smov 120  }
   0x5   :  { %2281 = vmatpush3.bf16.msra.mxu0 %v2278_v3  ;;  %2158 = vmatprep.subr.mxu1 %v2352_v8  ;;  %vm2355_vm1 = vmmov 0   ;;  %s2356_s0 = smov 112   ;;  %s2357_s28 = smov 96   ;;  %vm122_vm2 = vcmask 64512  }
   0x6   :  { %2283 = vmatprep.subr.bf16.mxu0 %v2282_v6  ;;  %2160 = vmatprep.mubr.msk.f32.mxu1 %vm2355_vm1, %v2352_v8  ;;  %s2358_s29 = smov 64  }
   0x9   :  { %2285 = vmatpush3.bf16.msra.mxu0 %v2282_v6 }
   0xa   :  { %2168 = vmatprep.subr.mxu0 %v2352_v8 }
   0xc   :  { %2156 = vmatmul.mubr.msk.f32.vlgmr.msra.gmra.mrb[0].mxu0 %vm24_vm0, %v19_v7 }
   0xd   :  { %2170 = vmatprep.mubr.msk.f32.mxu0 %vm2355_vm1, %v2352_v8 }
  0xdf   :  { %v2409_v9 = vpop.f32.mrb[0].mxu0 }
  0xe0   :  { %v2411_v10 = vpop.f32.mrb[1].mxu0 }
  0xe1   :  { %111 = vrot.lane.b32.xlu1 %v2411_v10, %s2353_s1  ;;  %107 = vrot.lane.b32.xlu0 %v2411_v10, %s2354_s27 }
  0xe5   :  { %114 = vrot.lane.b32.xlu1 %v2409_v9, %s2354_s27  ;;  %109 = vrot.lane.b32.xlu0 %v2411_v10, %s2356_s0 }
  0xe9   :  { %118 = vrot.lane.b32.xlu1 %v2409_v9, %s2353_s1  ;;  %116 = vrot.lane.b32.xlu0 %v2409_v9, %s2356_s0 }
  0xed   :  { %120 = vrot.lane.b32.xlu0 %v2411_v10, %s2357_s28 }
 0x153   :  { %v2424_v11 = vpop.permute.xlu1 %111  ;;  %v2426_v12 = vpop.permute.xlu0 %107 }
 0x154   :  { %197 = vrot.lane.b32.xlu1 %v2426_v12, %s2357_s28 }
 0x157   :  { %v2429_v13 = vpop.permute.xlu0 %109  ;;  %v2433_v14 = vpop.permute.xlu1 %114 }
 0x158   :  { %349 = vrot.lane.b32.xlu1 %v2424_v11, %s2357_s28  ;;  %273 = vrot.lane.b32.xlu0 %v2429_v13, %s2357_s28 }
 0x15b   :  { %v2435_v15 = vpop.permute.xlu0 %116  ;;  %v2439_v16 = vpop.permute.xlu1 %118 }
 0x15c   :  { %501 = vrot.lane.b32.xlu1 %v2433_v14, %s2357_s28  ;;  %425 = vrot.lane.b32.xlu0 %v2409_v9, %s2357_s28 }
 0x15f   :  { %v121_v17 = vpop.permute.xlu0 %120 }
 0x160   :  { %653 = vrot.lane.b32.xlu1 %v2439_v16, %s2357_s28  ;;  %577 = vrot.lane.b32.xlu0 %v2435_v15, %s2357_s28 }
 0x161   :  { %2159 = vmatpush3.xpose.msk.msra.mxu1 %vm122_vm2, %v121_v17 }
 0x162   :  { %2163 = vmatprep.subr.mxu1 %v2352_v8 }
 0x164   :  { %2161 = vmatmul.mubr.msk.f32.vlgmr.msra.gmra.mrb[0].mxu1 %vm122_vm2, %v2411_v10 }
 0x165   :  { %2165 = vmatprep.mubr.msk.f32.mxu1 %vm2355_vm1, %v2352_v8 }
 0x1c6   :  { %v198_v18 = vpop.permute.xlu1 %197 }
 0x1c7   :  { %2164 = vmatpush3.xpose.msk.msra.mxu1 %vm122_vm2, %v198_v18 }
 0x1c8   :  { %2173 = vmatprep.subr.mxu1 %v2352_v8 }
 0x1ca   :  { %v350_v19 = vpop.permute.xlu1 %349  ;;  %2166 = vmatmul.mubr.msk.f32.vlgmr.msra.gmra.mrb[2].mxu1 %vm122_vm2, %v2426_v12  ;;  %v274_v20 = vpop.permute.xlu0 %273 }
 0x1cb   :  { %2169 = vmatpush3.xpose.msk.msra.mxu0 %vm122_vm2, %v274_v20  ;;  %2174 = vmatpush3.xpose.msk.msra.mxu1 %vm122_vm2, %v350_v19 }
 0x1cc   :  { %2175 = vmatprep.mubr.msk.f32.mxu1 %vm2355_vm1, %v2352_v8  ;;  %2178 = vmatprep.subr.mxu0 %v2352_v8 }
 0x1cd   :  { %2183 = vmatprep.subr.mxu1 %v2352_v8 }
 0x1ce   :  { %v502_v21 = vpop.permute.xlu1 %501  ;;  %2171 = vmatmul.mubr.msk.f32.vlgmr.msra.gmra.mrb[2].mxu0 %vm122_vm2, %v2429_v13  ;;  %2176 = vmatmul.mubr.msk.f32.vlgmr.msra.gmra.mrb[4].mxu1 %vm122_vm2, %v2424_v11  ;;  %v426_v22 = vpop.permute.xlu0 %425 }
 0x1cf   :  { %2179 = vmatpush3.xpose.msk.msra.mxu0 %vm122_vm2, %v426_v22  ;;  %2184 = vmatpush3.xpose.msk.msra.mxu1 %vm122_vm2, %v502_v21 }
 0x1d0   :  { %2180 = vmatprep.mubr.msk.f32.mxu0 %vm2355_vm1, %v2352_v8  ;;  %2185 = vmatprep.mubr.msk.f32.mxu1 %vm2355_vm1, %v2352_v8 }
 0x1d1   :  { %2188 = vmatprep.subr.mxu0 %v2352_v8  ;;  %2193 = vmatprep.subr.mxu1 %v2352_v8 }
 0x1d2   :  { %v654_v23 = vpop.permute.xlu1 %653  ;;  %2181 = vmatmul.mubr.msk.f32.vlgmr.msra.gmra.mrb[4].mxu0 %vm122_vm2, %v2409_v9  ;;  %2186 = vmatmul.mubr.msk.f32.vlgmr.msra.gmra.mrb[6].mxu1 %vm122_vm2, %v2433_v14  ;;  %v578_v24 = vpop.permute.xlu0 %577 }
 0x1d3   :  { %2189 = vmatpush3.xpose.msk.msra.mxu0 %vm122_vm2, %v578_v24  ;;  %2194 = vmatpush3.xpose.msk.msra.mxu1 %vm122_vm2, %v654_v23 }
 0x1d4   :  { %2190 = vmatprep.mubr.msk.f32.mxu0 %vm2355_vm1, %v2352_v8  ;;  %2195 = vmatprep.mubr.msk.f32.mxu1 %vm2355_vm1, %v2352_v8 }
 0x1d5   :  { %2198 = vmatprep.subr.mxu0 %v2352_v8  ;;  %2203 = vmatprep.subr.mxu1 %v2352_v8 }
 0x1d6   :  { %2191 = vmatmul.mubr.msk.f32.vlgmr.msra.gmra.mrb[6].mxu0 %vm122_vm2, %v2435_v15  ;;  %2196 = vmatmul.mubr.msk.f32.vlgmr.msra.gmra.mrb[8].mxu1 %vm122_vm2, %v2439_v16 }
 0x1d7   :  { %2200 = vmatprep.mubr.msk.f32.mxu0 %vm2355_vm1, %v2352_v8  ;;  %2205 = vmatprep.mubr.msk.f32.mxu1 %vm2355_vm1, %v2352_v8 }
 0x237   :  { %v193_v25 = vpop.f32.mrb[0].mxu1 }
 0x238   :  { %v2162_v26 = vpop.f32.mrb[1].mxu1  ;;  %v729_v27 = vsel %vm122_vm2, %v193_v25, -inf }
 0x239   :  { %730 = vmax.xlane.f32.xlu0 %v729_v27 }
 0x29d   :  { %v269_v28 = vpop.f32.mrb[2].mxu1 }
 0x29e   :  { %v2167_v29 = vpop.f32.mrb[3].mxu1  ;;  %v732_v30 = vsel %vm122_vm2, %v269_v28, -inf }
 0x29f   :  { %733 = vmax.xlane.f32.xlu1 %v732_v30 }
 0x2a1   :  { %v345_v31 = vpop.f32.mrb[2].mxu0  ;;  %v421_v32 = vpop.f32.mrb[4].mxu1 }
 0x2a2   :  { %v2172_v33 = vpop.f32.mrb[3].mxu0  ;;  %v2177_v34 = vpop.f32.mrb[5].mxu1  ;;  %v735_v35 = vsel %vm122_vm2, %v345_v31, -inf  ;;  %v738_v40 = vsel %vm122_vm2, %v421_v32, -inf }
 0x2a3   :  { %736 = vmax.xlane.f32.xlu0 %v735_v35 }
 0x2a5   :  { %v497_v36 = vpop.f32.mrb[4].mxu0  ;;  %v573_v37 = vpop.f32.mrb[6].mxu1 }
 0x2a6   :  { %v2182_v38 = vpop.f32.mrb[5].mxu0  ;;  %v2187_v39 = vpop.f32.mrb[7].mxu1  ;;  %v741_v41 = vsel %vm122_vm2, %v497_v36, -inf  ;;  %v744_v46 = vsel %vm122_vm2, %v573_v37, -inf }
 0x2a7   :  { %739 = vmax.xlane.f32.xlu0 %v738_v40  ;;  %742 = vmax.xlane.f32.xlu1 %v741_v41 }
 0x2a9   :  { %v649_v42 = vpop.f32.mrb[6].mxu0  ;;  %v725_v43 = vpop.f32.mrb[8].mxu1 }
 0x2aa   :  { %v2192_v44 = vpop.f32.mrb[7].mxu0  ;;  %v2197_v45 = vpop.f32.mrb[9].mxu1  ;;  %v747_v47 = vsel %vm122_vm2, %v649_v42, -inf  ;;  %v750_v48 = vsel %vm122_vm2, %v725_v43, -inf }
 0x2ab   :  { %745 = vmax.xlane.f32.xlu0 %v744_v46  ;;  %748 = vmax.xlane.f32.xlu1 %v747_v47 }
 0x2af   :  { %751 = vmax.xlane.f32.xlu0 %v750_v48 }
 0x2bc   :  { %817 = vrot.lane.b32.xlu1 %v2411_v10, %s2358_s29 }
 0x2c0   :  { %969 = vrot.lane.b32.xlu1 %v2429_v13, %s2358_s29 }
 0x2c4   :  { %1045 = vrot.lane.b32.xlu1 %v2424_v11, %s2358_s29 }
 0x2c5   :  { %893 = vrot.lane.b32.xlu0 %v2426_v12, %s2358_s29 }
 0x2c6   :  { %v731_v49 = vpop.xlane.xlu0 %730 }
 0x2c7   :  { %v753_v50 = vsub.f32 %v193_v25, %v731_v49 }
 0x2c8   :  { %1197 = vrot.lane.b32.xlu1 %v2433_v14, %s2358_s29 }
 0x2c9   :  { %1121 = vrot.lane.b32.xlu0 %v2409_v9, %s2358_s29  ;;  %v761_v51 = vmul.f32 1.442695, %v753_v50 }
 0x2cb   :  { %2296 = vpow2.f32 %v761_v51 }
 0x2d5   :  { %v2511_v52 = vpop.eup %2296 }
 0x2d6   :  { %v777_v53 = vsel %vm122_vm2, %v2511_v52, 0.0 }
 0x2ec   :  { %778 = vadd.xlane.f32.xlu1 %v777_v53 }
 0x32c   :  { %v734_v54 = vpop.xlane.xlu1 %733 }
 0x32d   :  { %v754_v55 = vsub.f32 %v269_v28, %v734_v54  ;;  %v1425_v54 = vld [vmem:[%s2640_s2] sm:$0xff] }
 0x32f   :  { %v763_v56 = vmul.f32 1.442695, %v754_v55 }
 0x330   :  { %v737_v57 = vpop.xlane.xlu0 %736 }
 0x331   :  { %2298 = vpow2.f32 %v763_v56  ;;  %v755_v58 = vsub.f32 %v345_v31, %v737_v57 }
 0x333   :  { %v765_v59 = vmul.f32 1.442695, %v755_v58 }
 0x334   :  { %v743_v60 = vpop.xlane.xlu1 %742  ;;  %v740_v61 = vpop.xlane.xlu0 %739 }
 0x335   :  { %2300 = vpow2.f32 %v765_v59  ;;  %v757_v62 = vsub.f32 %v497_v36, %v743_v60  ;;  %v756_v63 = vsub.f32 %v421_v32, %v740_v61  ;;  %v1426_v59 = vld [vmem:[%s2640_s2 + $0x8] sm:$0xff]  ;;  %v1427_v60 = vld [vmem:[%s2640_s2 + $0x10] sm:$0xff] }
 0x337   :  { %v769_v0 = vmul.f32 1.442695, %v757_v62  ;;  %v767_v1 = vmul.f32 1.442695, %v756_v63  ;;  %v1428_v63 = vld [vmem:[%s2640_s2 + $0x18] sm:$0xff] }
 0x338   :  { %v749_v2 = vpop.xlane.xlu1 %748  ;;  %v746_v3 = vpop.xlane.xlu0 %745 }
 0x339   :  { %2302 = vpow2.f32 %v769_v0  ;;  %v759_v4 = vsub.f32 %v649_v42, %v749_v2  ;;  %v758_v5 = vsub.f32 %v573_v37, %v746_v3  ;;  %v1429_v2 = vld [vmem:[%s2640_s2 + $0x20] sm:$0xff] }
 0x33a   :  { %2304 = vpow2.f32 %v767_v1 }
 0x33b   :  { %v2299_v6 = vpop.eup %2298  ;;  %v773_v7 = vmul.f32 1.442695, %v759_v4  ;;  %v771_v9 = vmul.f32 1.442695, %v758_v5  ;;  %v1431_v5 = vld [vmem:[%s2640_s2 + $0x30] sm:$0xff] }
 0x33c   :  { %v818_v10 = vpop.permute.xlu1 %817  ;;  %v752_v11 = vpop.xlane.xlu0 %751  ;;  %v780_v12 = vsel %vm122_vm2, %v2299_v6, 0.0 }
 0x33d   :  { %2306 = vpow2.f32 %v773_v7  ;;  %v760_v13 = vsub.f32 %v725_v43, %v752_v11  ;;  %781 = vadd.xlane.f32.xlu0 %v780_v12  ;;  %2199 = vmatpush3.msra.mxu0 %v818_v10  ;;  %v1430_v7 = vld [vmem:[%s2640_s2 + $0x28] sm:$0xff] }
 0x33e   :  { %2308 = vpow2.f32 %v771_v9  ;;  %2208 = vmatprep.subr.mxu0 %v2352_v8 }
 0x33f   :  { %v2301_v14 = vpop.eup %2300  ;;  %v775_v17 = vmul.f32 1.442695, %v760_v13  ;;  %v1432_v13 = vld [vmem:[%s2640_s2 + $0x38] sm:$0xff] }
 0x340   :  { %v894_v18 = vpop.permute.xlu0 %893  ;;  %v783_v19 = vsel %vm122_vm2, %v2301_v14, 0.0  ;;  %v970_v30 = vpop.permute.xlu1 %969 }
 0x341   :  { %2310 = vpow2.f32 %v775_v17  ;;  %784 = vadd.xlane.f32.xlu1 %v783_v19  ;;  %2204 = vmatpush3.msra.mxu1 %v894_v18 }
 0x342   :  { %2213 = vmatprep.subr.mxu1 %v2352_v8 }
 0x343   :  { %v2303_v20 = vpop.eup %2302 }
 0x344   :  { %v2305_v21 = vpop.eup %2304  ;;  %v789_v22 = vsel %vm122_vm2, %v2303_v20, 0.0  ;;  %v1046_v31 = vpop.permute.xlu1 %1045 }
 0x345   :  { %790 = vadd.xlane.f32.xlu1 %v789_v22  ;;  %v786_v23 = vsel %vm122_vm2, %v2305_v21, 0.0 }
 0x346   :  { %787 = vadd.xlane.f32.xlu0 %v786_v23 }
 0x347   :  { %v2307_v24 = vpop.eup %2306 }
 0x348   :  { %v2309_v25 = vpop.eup %2308  ;;  %v795_v26 = vsel %vm122_vm2, %v2307_v24, 0.0  ;;  %v1198_v32 = vpop.permute.xlu1 %1197 }
 0x349   :  { %796 = vadd.xlane.f32.xlu1 %v795_v26  ;;  %v792_v27 = vsel %vm122_vm2, %v2309_v25, 0.0 }
 0x34a   :  { %793 = vadd.xlane.f32.xlu0 %v792_v27 }
 0x34b   :  { %v2523_v28 = vpop.eup %2310 }
 0x34c   :  { %v798_v29 = vsel %vm122_vm2, %v2523_v28, 0.0 }
 0x34e   :  { %799 = vadd.xlane.f32.xlu0 %v798_v29 }
 0x35a   :  { %1349 = vrot.lane.b32.xlu1 %v2439_v16, %s2358_s29  ;;  %v1122_v16 = vpop.permute.xlu0 %1121 }
 0x364   :  { %1273 = vrot.lane.b32.xlu0 %v2435_v15, %s2358_s29 }
 0x379   :  { %v779_v33 = vpop.xlane.xlu1 %778 }
 0x37a   :  { %2312 = vrcp.f32 %v779_v33 }
 0x384   :  { %v2313_v34 = vpop.eup %2312 }
 0x385   :  { %v809_v35 = vmul.f32 %v2313_v34, %v2511_v52 }
 0x387   :  { %2201 = vmatmul.mubr.msk.f32.vlgmr.msra.gmra.mrb[8].mxu0 %vm122_vm2, %v809_v35  ;;  %v2092_v35 = vld [vmem:[%s2641_s3] ss:$0 sm:$0xff]  ;;  %s2359_s3 = smov [#allocation2]  }
 0x388   :  { %2209 = vmatpush3.msra.mxu0 %v970_v30  ;;  %2210 = vmatprep.mubr.msk.f32.mxu0 %vm2355_vm1, %v2352_v8  ;;  %s2047_s21 = sshll.u32 %s2359_s3, 4  ;;  %s2048_s21 = int_to_ptr.vmem [resolvable:$true] %s2047_s21 }
 0x389   :  { %2218 = vmatprep.subr.mxu0 %v2352_v8  ;;  %s2328_s22 = scalar_lea.vmem %s2048_s21, 256  ;;  %p2333_p1 = scmp.lt.s32.totalorder %s2048_s21, %s2048_s21 }
 0x38a   :  { %p2329_p0 = scmp.ne.s32.totalorder %s2048_s21, %s2328_s22  ;;  %p2334_p2 = scmp.lt.s32.totalorder %s2328_s22, %s2328_s22 }
 0x38c   :  { %p2335_p3 = por %p2334_p2, %p2333_p1 }
 0x38e   :  { %p2336_p4 = pnand %p2335_p3, %p2329_p0 }
 0x3ca   :  { %v782_v36 = vpop.xlane.xlu0 %781 }
 0x3cb   :  { %2314 = vrcp.f32 %v782_v36 }
 0x3ce   :  { %v785_v15 = vpop.xlane.xlu1 %784 }
 0x3cf   :  { %2316 = vrcp.f32 %v785_v15 }
 0x3d2   :  { %v791_v37 = vpop.xlane.xlu1 %790 }
 0x3d3   :  { %2318 = vrcp.f32 %v791_v37  ;;  %v788_v38 = vpop.xlane.xlu0 %787 }
 0x3d4   :  { %2320 = vrcp.f32 %v788_v38 }
 0x3d5   :  { %v2315_v39 = vpop.eup %2314 }
 0x3d6   :  { %v810_v40 = vmul.f32 %v2315_v39, %v2299_v6  ;;  %v797_v41 = vpop.xlane.xlu1 %796 }
 0x3d7   :  { %2322 = vrcp.f32 %v797_v41  ;;  %v794_v42 = vpop.xlane.xlu0 %793 }
 0x3d8   :  { %2324 = vrcp.f32 %v794_v42  ;;  %2206 = vmatmul.mubr.msk.f32.vlgmr.msra.gmra.mrb[10].mxu1 %vm122_vm2, %v810_v40 }
 0x3d9   :  { %v2317_v43 = vpop.eup %2316  ;;  %2214 = vmatpush3.msra.mxu1 %v1046_v31  ;;  %2215 = vmatprep.mubr.msk.f32.mxu1 %vm2355_vm1, %v2352_v8 }
 0x3da   :  { %v811_v44 = vmul.f32 %v2317_v43, %v2301_v14  ;;  %2223 = vmatprep.subr.mxu1 %v2352_v8  ;;  %v1350_v56 = vpop.permute.xlu1 %1349 }
 0x3db   :  { %v800_v45 = vpop.xlane.xlu0 %799 }
 0x3dc   :  { %2326 = vrcp.f32 %v800_v45  ;;  %2211 = vmatmul.mubr.msk.f32.vlgmr.msra.gmra.mrb[10].mxu0 %vm122_vm2, %v811_v44 }
 0x3dd   :  { %v2319_v46 = vpop.eup %2318  ;;  %2219 = vmatpush3.msra.mxu0 %v1122_v16  ;;  %2220 = vmatprep.mubr.msk.f32.mxu0 %vm2355_vm1, %v2352_v8 }
 0x3de   :  { %v2321_v47 = vpop.eup %2320  ;;  %v813_v48 = vmul.f32 %v2319_v46, %v2303_v20  ;;  %2228 = vmatprep.subr.mxu0 %v2352_v8 }
 0x3df   :  { %v812_v49 = vmul.f32 %v2321_v47, %v2305_v21  ;;  %v1274_v50 = vpop.permute.xlu0 %1273 }
 0x3e0   :  { %2221 = vmatmul.mubr.msk.f32.vlgmr.msra.gmra.mrb[12].mxu0 %vm122_vm2, %v813_v48 }
 0x3e1   :  { %v2323_v51 = vpop.eup %2322  ;;  %2216 = vmatmul.mubr.msk.f32.vlgmr.msra.gmra.mrb[12].mxu1 %vm122_vm2, %v812_v49  ;;  %2229 = vmatpush3.msra.mxu0 %v1274_v50 }
 0x3e2   :  { %v2325_v52 = vpop.eup %2324  ;;  %v815_v53 = vmul.f32 %v2323_v51, %v2307_v24  ;;  %2224 = vmatpush3.msra.mxu1 %v1198_v32  ;;  %2225 = vmatprep.mubr.msk.f32.mxu1 %vm2355_vm1, %v2352_v8 }
 0x3e3   :  { %v814_v55 = vmul.f32 %v2325_v52, %v2309_v25  ;;  %2230 = vmatprep.mubr.msk.f32.mxu0 %vm2355_vm1, %v2352_v8  ;;  %2233 = vmatprep.subr.mxu1 %v2352_v8 }
 0x3e4   :  { %2231 = vmatmul.mubr.msk.f32.vlgmr.msra.gmra.mrb[14].mxu0 %vm122_vm2, %v815_v53  ;;  %2238 = vmatprep.subr.mxu0 %v2352_v8 }
 0x3e5   :  { %2226 = vmatmul.mubr.msk.f32.vlgmr.msra.gmra.mrb[14].mxu1 %vm122_vm2, %v814_v55  ;;  %2239 = vmatpush3.msra.mxu0 %v1425_v54 }
 0x3e6   :  { %v2327_v57 = vpop.eup %2326  ;;  %2234 = vmatpush3.msra.mxu1 %v1350_v56  ;;  %2235 = vmatprep.mubr.msk.f32.mxu1 %vm2355_vm1, %v2352_v8 }
 0x3e7   :  { %v816_v58 = vmul.f32 %v2327_v57, %v2523_v28  ;;  %2240 = vmatprep.mubr.msk.f32.mxu0 %vm2355_vm1, %v2352_v8  ;;  %2243 = vmatprep.subr.mxu1 %v2352_v8 }
 0x3e8   :  { %2248 = vmatprep.subr.mxu0 %v2352_v8 }
 0x3e9   :  { %2236 = vmatmul.mubr.msk.f32.vlgmr.msra.gmra.mrb[16].mxu1 %vm122_vm2, %v816_v58 }
 0x3ea   :  { %2245 = vmatprep.mubr.msk.f32.mxu1 %vm2355_vm1, %v2352_v8  ;;  %2244 = vmatpush3.msra.mxu1 %v1426_v59 }
 0x3eb   :  { %2253 = vmatprep.subr.mxu1 %v2352_v8 }
 0x45a   :  { %v889_v61 = vpop.f32.mrb[8].mxu0 }
 0x45b   :  { %v2202_v62 = vpop.f32.mrb[9].mxu0  ;;  %2241 = vmatmul.mubr.msk.f32.vlgmr.msra.gmra.mrb[16].mxu0 %vm122_vm2, %v889_v61 }
 0x45c   :  { %2249 = vmatpush3.msra.mxu0 %v1427_v60  ;;  %2250 = vmatprep.mubr.msk.f32.mxu0 %vm2355_vm1, %v2352_v8 }
 0x45d   :  { %2258 = vmatprep.subr.mxu0 %v2352_v8 }
 0x4ab   :  { %v965_v0 = vpop.f32.mrb[10].mxu1 }
 0x4ac   :  { %v2207_v1 = vpop.f32.mrb[11].mxu1  ;;  %2246 = vmatmul.mubr.msk.f32.vlgmr.msra.gmra.mrb[18].mxu1 %vm122_vm2, %v965_v0 }
 0x4ad   :  { %2254 = vmatpush3.msra.mxu1 %v1428_v63  ;;  %2255 = vmatprep.mubr.msk.f32.mxu1 %vm2355_vm1, %v2352_v8 }
 0x4ae   :  { %2263 = vmatprep.subr.mxu1 %v2352_v8 }
 0x4af   :  { %v1041_v3 = vpop.f32.mrb[10].mxu0 }
 0x4b0   :  { %v2212_v4 = vpop.f32.mrb[11].mxu0  ;;  %2251 = vmatmul.mubr.msk.f32.vlgmr.msra.gmra.mrb[18].mxu0 %vm122_vm2, %v1041_v3 }
 0x4b1   :  { %2259 = vmatpush3.msra.mxu0 %v1429_v2  ;;  %2260 = vmatprep.mubr.msk.f32.mxu0 %vm2355_vm1, %v2352_v8 }
 0x4b2   :  { %2268 = vmatprep.subr.mxu0 %v2352_v8 }
 0x4b3   :  { %v1193_v6 = vpop.f32.mrb[12].mxu0 }
 0x4b4   :  { %v1117_v9 = vpop.f32.mrb[12].mxu1  ;;  %v2222_v10 = vpop.f32.mrb[13].mxu0  ;;  %2261 = vmatmul.mubr.msk.f32.vlgmr.msra.gmra.mrb[20].mxu0 %vm122_vm2, %v1193_v6 }
 0x4b5   :  { %v2217_v11 = vpop.f32.mrb[13].mxu1  ;;  %2256 = vmatmul.mubr.msk.f32.vlgmr.msra.gmra.mrb[20].mxu1 %vm122_vm2, %v1117_v9  ;;  %2269 = vmatpush3.msra.mxu0 %v1431_v5 }
 0x4b6   :  { %2264 = vmatpush3.msra.mxu1 %v1430_v7  ;;  %2265 = vmatprep.mubr.msk.f32.mxu1 %vm2355_vm1, %v2352_v8 }
 0x4b7   :  { %v1345_v12 = vpop.f32.mrb[14].mxu0  ;;  %2270 = vmatprep.mubr.msk.f32.mxu0 %vm2355_vm1, %v2352_v8  ;;  %2273 = vmatprep.subr.mxu1 %v2352_v8 }
 0x4b8   :  { %v1269_v14 = vpop.f32.mrb[14].mxu1  ;;  %v2232_v17 = vpop.f32.mrb[15].mxu0  ;;  %2271 = vmatmul.mubr.msk.f32.vlgmr.msra.gmra.mrb[22].mxu0 %vm122_vm2, %v1345_v12 }
 0x4b9   :  { %v2227_v18 = vpop.f32.mrb[15].mxu1  ;;  %2266 = vmatmul.mubr.msk.f32.vlgmr.msra.gmra.mrb[22].mxu1 %vm122_vm2, %v1269_v14 }
 0x4ba   :  { %2274 = vmatpush3.msra.mxu1 %v1432_v13  ;;  %2275 = vmatprep.mubr.msk.f32.mxu1 %vm2355_vm1, %v2352_v8 }
 0x4bc   :  { %v1421_v19 = vpop.f32.mrb[16].mxu1 }
 0x4bd   :  { %v2237_v20 = vpop.f32.mrb[17].mxu1  ;;  %2276 = vmatmul.mubr.msk.f32.vlgmr.msra.gmra.mrb[24].mxu1 %vm122_vm2, %v1421_v19 }
 0x52e   :  { %v1502_v21 = vpop.f32.mrb[16].mxu0 }
 0x52f   :  { %v2242_v22 = vpop.f32.mrb[17].mxu0  ;;  %v2017_v24 = vsel %vm24_vm0, %v1502_v21, 0.0 }
 0x57f   :  { %v1575_v23 = vpop.f32.mrb[18].mxu1 }
 0x580   :  { %v2018_v25 = vsel %vm24_vm0, %v1575_v23, 0.0  ;;  %v2247_v26 = vpop.f32.mrb[19].mxu1 }
 0x581   :  { %v2019_v27 = vadd.f32 %v2018_v25, %v2017_v24 }
 0x583   :  { %v1648_v28 = vpop.f32.mrb[18].mxu0 }
 0x584   :  { %v2020_v29 = vsel %vm24_vm0, %v1648_v28, 0.0  ;;  %v2252_v30 = vpop.f32.mrb[19].mxu0 }
 0x585   :  { %v2021_v31 = vadd.f32 %v2020_v29, %v2019_v27 }
 0x587   :  { %v1794_v32 = vpop.f32.mrb[20].mxu0 }
 0x588   :  { %v1721_v8 = vpop.f32.mrb[20].mxu1  ;;  %v2262_v33 = vpop.f32.mrb[21].mxu0  ;;  %v2024_v40 = vsel %vm24_vm0, %v1794_v32, 0.0 }
 0x589   :  { %v2022_v34 = vsel %vm24_vm0, %v1721_v8, 0.0  ;;  %v2257_v16 = vpop.f32.mrb[21].mxu1 }
 0x58a   :  { %v2023_v36 = vadd.f32 %v2022_v34, %v2021_v31 }
 0x58b   :  { %v1940_v15 = vpop.f32.mrb[22].mxu0 }
 0x58c   :  { %v2038_v37 = vadd.f32 %v2092_v35, %v2023_v36  ;;  %v1867_v38 = vpop.f32.mrb[22].mxu1  ;;  %v2272_v39 = vpop.f32.mrb[23].mxu0  ;;  %v2027_v44 = vsel %vm24_vm0, %v1940_v15, 0.0 }
 0x58d   :  { %v2025_v41 = vsel %vm24_vm0, %v1867_v38, 0.0  ;;  %v2267_v42 = vpop.f32.mrb[23].mxu1 }
 0x58e   :  { %2040 = vst.msk [vmem:[#allocation2] sm:$0xff] %vm24_vm0, %v2038_v37  ;;  %v2026_v43 = vadd.f32 %v2025_v41, %v2024_v40 }
 0x590   :  { %v2028_v45 = vadd.f32 %v2027_v44, %v2026_v43  ;;  %v2013_v46 = vpop.f32.mrb[24].mxu1 }
 0x591   :  { %v2029_v47 = vsel %vm24_vm0, %v2013_v46, 0.0  ;;  %v2277_v48 = vpop.f32.mrb[25].mxu1 }
 0x592   :  { %v2030_v49 = vadd.f32 %v2029_v47, %v2028_v45 }
 0x594   :  { %v2039_v50 = vadd.f32 %v2092_v35, %v2030_v49 }
 0x596   :  { %2041 = vst.msk [vmem:[#allocation2 + $0x8] sm:$0xff] %vm24_vm0, %v2039_v50 }
 0x597   :  { %2339 = shalt.err (!%p2336_p4)
}
 0x598   :  { %s2340_s25 = scalar_lea.hbm %s2642_s4, 256 }
 0x599   :  { %p2341_p5 = scmp.ne.s32.totalorder %s2642_s4, %s2340_s25  ;;  %p2344_p6 = scmp.lt.u32.totalorder %s2340_s25, %s2642_s4 }
 0x59b   :  { %p2346_p7 = pnand %p2344_p6, %p2341_p5 }
 0x59d   :  { %2349 = shalt.err (!%p2346_p7)
}
 0x59e   :  { %s2360_s28 = smov 128   ;;  %s2361_s29 = smov 8  }
 0x59f   :  { %2053 = dma.vmem_to_hbm [thread:$0]  %s2048_s21, 256, %s2642_s4, [#allocation3], %s2360_s28, %s2360_s28, %s2361_s29  }
 0x5a0   :  { %2350 = dma.done.wait [#allocation3], 256  }
 0x5a1   :  { %2351 = vsyncadd [#allocation3], 4294967040 }
 0x5a2   :  { %2057 = vsyncpa [#allocation3], 1 }

</bundles_post_ra>
